<compile_context>
chip_gen: v5e
topology: v5e:2x2
jax: 0.10.0
libtpu: 0.0.40
codegen_flags: <defaults>
</compile_context>

<pallas_src>
import jax
import jax.numpy as jnp
from jax.experimental import pallas as pl
from jax.experimental.pallas import tpu as pltpu


def _drop_channels_kernel(drop_ref, fill_ref, x_ref, o_ref):
    # drop_ref: (BR, 1) float32, > 0.5 means "drop this row"
    # fill_ref: (BR, 1) x.dtype, value to pad dropped rows with
    # x_ref / o_ref: (BR, BL) tile of the flattened (T*C, H*W_padded) input
    o_ref[...] = jnp.where(drop_ref[...] > 0.5, fill_ref[...], x_ref[...])


def drop_channels_pallas(x2d, row_drop, row_fill, *,
                         max_block_bytes=4 << 20,
                         min_parallel_blocks=8,
                         vmem_limit_bytes=48 << 20,
                         in_place=False):
    """x2d: (T*C, H*W). row_drop: (T*C,1) f32. row_fill: (T*C,1) x.dtype."""
    rows, cols = x2d.shape
    itemsize = jnp.dtype(x2d.dtype).itemsize

    # --- lane-density guard: pad cols to a multiple of 128 so stores are
    # full-width vst (no masked partial stores); slice back at the end.
    cols_p = max(128, ((cols + 127) // 128) * 128)
    if cols_p != cols:
        x2d = jnp.pad(x2d, ((0, 0), (0, cols_p - cols)))

    # Lane (last) dim: full padded dim or a large multiple of 128
    # (f32 -> 4096, bf16 -> 8192, int8 -> 16384) -> unmasked full-vreg stores.
    lane_target = max(128, 16384 // itemsize)
    bl = cols_p if cols_p <= lane_target else lane_target

    # Sublane (second-last) dim: multiple of 8/16/32 by dtype, capped so a
    # block is ~4 MiB.  Double-buffered in+out => ~16 MiB VMEM, under the
    # explicit 48 MiB limit (and under v7x's 32 MiB scoped default anyway).
    sub = max(8, 32 // itemsize)
    max_rows = max(sub, (max_block_bytes // max(1, bl * itemsize)) // sub * sub)
    br = rows if rows <= max_rows else max_rows

    # --- megacore guard (v7x: 2 TCs): keep at least a handful of blocks so
    # the "parallel" grid axes can actually be sharded across cores.
    def _nblocks(br_, bl_):
        return pl.cdiv(rows, br_) * pl.cdiv(cols_p, bl_)

    while _nblocks(br, bl) < min_parallel_blocks and br > sub:
        br = max(sub, ((br // 2) + sub - 1) // sub * sub)
    while _nblocks(br, bl) < min_parallel_blocks and bl >= 256 and bl % 256 == 0:
        bl //= 2

    grid = (pl.cdiv(rows, br), pl.cdiv(cols_p, bl))

    extra = {}
    if in_place:
        # The op is naturally in-place (reference mutates x); alias x2d->out
        # for callers that donate x to avoid a second (rows x cols) buffer.
        extra["input_output_aliases"] = {2: 0}

    out = pl.pallas_call(
        _drop_channels_kernel,
        out_shape=jax.ShapeDtypeStruct((rows, cols_p), x2d.dtype),
        grid=grid,
        in_specs=[
            # drop/fill block index is (i, 0): constant across the inner j
            # loop, so their DMAs are issued once per row-block only.
            pl.BlockSpec((br, 1), lambda i, j: (i, 0)),   # drop flags
            pl.BlockSpec((br, 1), lambda i, j: (i, 0)),   # fill values
            pl.BlockSpec((br, bl), lambda i, j: (i, j)),  # x tile
        ],
        out_specs=pl.BlockSpec((br, bl), lambda i, j: (i, j)),
        compiler_params=pltpu.CompilerParams(
            dimension_semantics=("parallel", "parallel"),
            vmem_limit_bytes=vmem_limit_bytes),
        cost_estimate=pl.CostEstimate(
            flops=0, transcendentals=0,
            bytes_accessed=2 * rows * cols_p * itemsize),
        **extra,
    )(row_drop, row_fill, x2d)

    if cols_p != cols:
        out = out[:, :cols]
    return out


def drop_channels_forward(x, key, channel_probs, fill_values,
                          tie_channels=None, all_channel_drop=False,
                          in_place=False):
    """Full DropChannels forward for CxHxW or TxCxHxW inputs.

    Randomness + tie/all-drop logic is plain JAX; the per-element fill/copy
    select is the Pallas kernel. Returns (output, drop_mask_i32).
    """
    squeeze = False
    if x.ndim == 3:            # CxHxW  -> treat as T=1
        x = x[None]
        squeeze = True
    assert x.ndim == 4, f"Expected 3 or 4 dims, got {x.ndim}"

    channel_probs = jnp.asarray(channel_probs, dtype=jnp.float32)
    fill_arr = jnp.asarray(fill_values, dtype=jnp.float32)
    T, C, H, W = x.shape
    assert channel_probs.shape[0] == C

    # to_drop[c] = random() < channel_probs[c]
    u = jax.random.uniform(key, (C,), dtype=jnp.float32)
    to_drop = u < channel_probs

    # tie_channels: tied channels follow the first one's decision
    if tie_channels is not None:
        first = to_drop[tie_channels[0]]
        for idx in tie_channels[1:]:
            to_drop = to_drop.at[idx].set(first)

    # if all channels dropped and all_channel_drop is False -> drop none
    if not all_channel_drop:
        all_dropped = jnp.all(to_drop)
        to_drop = jnp.where(all_dropped, jnp.zeros_like(to_drop), to_drop)

    rows, cols = T * C, H * W
    x2d = x.reshape(rows, cols)                      # free, row-major reshape
    # row r corresponds to channel r % C
    row_drop = jnp.tile(to_drop.astype(jnp.float32), T).reshape(rows, 1)
    # NOTE: fill is cast to x.dtype; integer inputs truncate toward zero --
    # same behaviour as the reference's in-place assignment into an int tensor.
    row_fill = jnp.tile(fill_arr, T).astype(x.dtype).reshape(rows, 1)

    out = drop_channels_pallas(
        x2d, row_drop, row_fill, in_place=in_place).reshape(T, C, H, W)
    if squeeze:
        out = out[0]
    return out, to_drop.astype(jnp.int32)


if __name__ == "__main__":
    key = jax.random.PRNGKey(0)
    k_x, k_drop, k_x3, k_drop3, k_xp, k_dropp = jax.random.split(key, 6)

    # --- 4-D case: T=2 frames, C=4 channels (e.g. RGBD), 16x16 ---
    T, C, H, W = 2, 4, 16, 16
    x = jax.random.normal(k_x, (T, C, H, W), dtype=jnp.float32)
    channel_probs = [0.5, 0.5, 0.5, 0.9]   # RGB tied, D independent
    fill_values = [0.0, 0.0, 0.0, -1.0]

    out, drop_mask = drop_channels_forward(
        x, k_drop, channel_probs, fill_values,
        tie_channels=[0, 1, 2], all_channel_drop=False)
    out = jax.block_until_ready(out)

    fill_arr = jnp.asarray(fill_values, dtype=jnp.float32)
    mask = drop_mask.astype(bool)[None, :, None, None]
    ref = jnp.where(mask, fill_arr[None, :, None, None], x)
    assert out.shape == x.shape and out.dtype == x.dtype
    assert bool(jnp.allclose(out, ref)), "4-D mismatch vs reference"

    # --- 3-D case: C=3, 16x16 ---
    x3 = jax.random.normal(k_x3, (3, 16, 16), dtype=jnp.float32)
    probs3 = [0.7, 0.7, 0.7]
    fills3 = [1.5, -2.0, 0.25]
    out3, drop3 = drop_channels_forward(x3, k_drop3, probs3, fills3)
    out3 = jax.block_until_ready(out3)

    fill3_arr = jnp.asarray(fills3, dtype=jnp.float32)
    mask3 = drop3.astype(bool)[:, None, None]
    ref3 = jnp.where(mask3, fill3_arr[:, None, None], x3)
    assert out3.shape == x3.shape and out3.dtype == x3.dtype
    assert bool(jnp.allclose(out3, ref3)), "3-D mismatch vs reference"

    # --- non-multiple-of-128 spatial (exercises the lane-padding path) ---
    xp = jax.random.normal(k_xp, (4, 12, 12), dtype=jnp.float32)  # cols = 144
    probsp = [0.9, 0.1, 0.9, 0.9]
    fillsp = [3.0, 0.5, -1.0, 2.0]
    outp, dropp = drop_channels_forward(xp, k_dropp, probsp, fillsp)
    outp = jax.block_until_ready(outp)

    fillp_arr = jnp.asarray(fillsp, dtype=jnp.float32)
    maskp = dropp.astype(bool)[:, None, None]
    refp = jnp.where(maskp, fillp_arr[:, None, None], xp)
    assert outp.shape == xp.shape and outp.dtype == xp.dtype
    assert bool(jnp.allclose(outp, refp)), "padded-cols mismatch vs reference"

    print("KERNEL_OK")
</pallas_src>

<mosaic_0001>
module attributes {stable_mosaic.version = 11 : i64} {
  func.func @_drop_channels_kernel(%arg0: i32, %arg1: i32, %arg2: memref<8x1xf32, #tpu.memory_space<vmem>>, %arg3: memref<8x1xf32, #tpu.memory_space<vmem>>, %arg4: memref<8x128xf32, #tpu.memory_space<vmem>>, %arg5: memref<8x128xf32, #tpu.memory_space<vmem>>) attributes {dimension_semantics = [#tpu.dimension_semantics<parallel>, #tpu.dimension_semantics<parallel>], iteration_bounds = array<i64: 1, 2>, scalar_prefetch = 0 : i64, scratch_operands = 0 : i64, tpu.core_type = #tpu.core_type<tc>, window_params = [{transform_indices = @transform_0, window_bounds = array<i64: 8, 1>}, {transform_indices = @transform_1, window_bounds = array<i64: 8, 1>}, {transform_indices = @transform_2, window_bounds = array<i64: 8, 128>}, {transform_indices = @transform_3, window_bounds = array<i64: 8, 128>}]} {
    %c0 = arith.constant 0 : index
    %c0_0 = arith.constant 0 : index
    %0 = vector.load %arg2[%c0, %c0_0] : memref<8x1xf32, #tpu.memory_space<vmem>>, vector<8x1xf32>
    %cst = arith.constant 5.000000e-01 : f32
    %1 = vector.broadcast %cst : f32 to vector<8x1xf32>
    %2 = arith.cmpf ogt, %0, %1 : vector<8x1xf32>
    %c0_1 = arith.constant 0 : index
    %c0_2 = arith.constant 0 : index
    %3 = vector.load %arg3[%c0_1, %c0_2] : memref<8x1xf32, #tpu.memory_space<vmem>>, vector<8x1xf32>
    %c0_3 = arith.constant 0 : index
    %c0_4 = arith.constant 0 : index
    %4 = vector.load %arg4[%c0_3, %c0_4] : memref<8x128xf32, #tpu.memory_space<vmem>>, vector<8x128xf32>
    %5 = vector.shape_cast %2 : vector<8x1xi1> to vector<8x1xi1>
    %6 = vector.broadcast %5 : vector<8x1xi1> to vector<8x128xi1>
    %7 = vector.shape_cast %3 : vector<8x1xf32> to vector<8x1xf32>
    %8 = vector.broadcast %7 : vector<8x1xf32> to vector<8x128xf32>
    %9 = arith.select %6, %8, %4 : vector<8x128xi1>, vector<8x128xf32>
    %c0_5 = arith.constant 0 : index
    %c0_6 = arith.constant 0 : index
    %10 = vector.load %arg5[%c0_5, %c0_6] : memref<8x128xf32, #tpu.memory_space<vmem>>, vector<8x128xf32>
    tpu.vector_store %arg5[%c0_5, %c0_6], %9 {strides = array<i32>} : memref<8x128xf32, #tpu.memory_space<vmem>>, vector<8x128xf32>,
    return
  }
  func.func @transform_0(%arg0: i32, %arg1: i32) -> (i32, i32) {
    %c0_i32 = arith.constant 0 : i32
    %c0_i32_0 = arith.constant 0 : i32
    return %arg0, %c0_i32 : i32, i32
  }
  func.func @transform_1(%arg0: i32, %arg1: i32) -> (i32, i32) {
    %c0_i32 = arith.constant 0 : i32
    %c0_i32_0 = arith.constant 0 : i32
    return %arg0, %c0_i32 : i32, i32
  }
  func.func @transform_2(%arg0: i32, %arg1: i32) -> (i32, i32) {
    %c0_i32 = arith.constant 0 : i32
    return %arg0, %arg1 : i32, i32
  }
  func.func @transform_3(%arg0: i32, %arg1: i32) -> (i32, i32) {
    %c0_i32 = arith.constant 0 : i32
    return %arg0, %arg1 : i32, i32
  }
}

</mosaic_0001>

<bundles_post_ra>
// kernel: tpu_custom_call.1
= control target key start
LH: loop header
LB: loop body
LE: loop exit
PB: predicated region body
PF: predicated region fallthrough
CT: control target
= control target key end

     0   :  { %8 = vsyncpa [#allocation3], 0  ;;  %s641_s0 = inlined_call_operand.vmem [shape: f32[8,1], index: 0, kind: input, shape index: {}]   ;;  %s642_s1 = inlined_call_operand.vmem [shape: f32[8,1], index: 1, kind: input, shape index: {}]   ;;  %s643_s2 = inlined_call_operand.vmem [shape: f32[8,256], index: 2, kind: input, shape index: {}]   ;;  %s644_s3 = inlined_call_operand.hbm [shape: f32[8,256], index: 3, kind: output, shape index: {}]  }
   0x1   :  { %10 = vsyncpa [#allocation3 + $0x1], 0  ;;  %s538_s12 = smov 0   ;;  %s540_s13 = smov 0  }
   0x2   :  { %s542_s14 = smov 0   ;;  %s544_s15 = smov 0  }
   0x3   :  { %s546_s16 = smov 0   ;;  %s548_s17 = smov 0  }
   0x4 LB: > { %s367_s18 = sadd.s32 4294967295, %s515_s17   ;;  %s368_s19 = sadd.s32 4294967294, %s515_s17   ;;  %s515_s17 = sphi %s548_s17, %s16_s17   ;;  %s511_s16 = sphi %s546_s16, %s651_s16   ;;  %s507_s15 = sphi %s544_s15, %s650_s15   ;;  %s503_s14 = sphi %s542_s14, %s649_s14   ;;  %s499_s13 = sphi %s540_s13, %s648_s13   ;;  %s495_s12 = sphi %s538_s12, %s647_s12  }
   0x5   : > { %s25_s20 = sadd.s32 1, %s511_s16  ;;  %s117_s21 = sadd.s32 1, %s503_s14 }
   0x6   : > { %p26_p0 = scmp.ge.s32.totalorder %s25_s20, 2  ;;  %p127_p1 = scmp.ne.s32.totalorder %s503_s14, %s499_s13 }
   0x7   : > { %p128_p2 = scmp.eq.s32.totalorder %s367_s18, 1  ;;  %p133_p3 = scmp.ne.s32.totalorder %s499_s13, %s495_s12 }
   0x8   : > { %s653_s20 = smov (%p26_p0, %s25_s20), 0  ;;  %p134_p5 = scmp.eq.s32.totalorder %s368_s19, 1 }
   0x9   : > { %p578_p4 = por %p128_p2, %p127_p1  ;;  %s113_s23 = ssub.s32 %s511_s16, %s653_s20 }
   0xa   : > { %p373_p6 = scmp.ge.s32.totalorder %s515_s17, 1  ;;  %p115_p7 = scmp.eq.s32.totalorder %s113_s23, 0 }
   0xb   : > { %p585_p8 = por %p134_p5, %p133_p3  ;;  %p177_p9 = scmp.lt.s32.totalorder %s515_s17, 3 }
   0xc   : > { %s591_s25 = scalar_select %p115_p7, %s503_s14, %s117_s21  }
   0xd   : > { %p178_p10 = pnand %p373_p6, %p177_p9 }
   0xe   : > { %p222_p11 = scmp.lt.s32.totalorder (!%p178_p10), %s507_s15, 1  ;;  %s209_s30 = sand.u32 (!%p178_p10), 1, %s499_s13  }
   0xf   : > { %181 = sbr.rel (%p178_p10) target bundleno = 150 (0x96), region = 32  ;;  %s374_s5 = sshll.u32 (!%p178_p10), %s209_s30, 3 }
  0x10   : > { %s377_s6 = sshll.u32 (!%p178_p10), %s507_s15, 3  ;;  %s211_s21 = scalar_lea.vmem (!%p178_p10), [#allocation2], %s374_s5 }
  0x11   : > { %s257_s10 = scalar_lea.hbm (!%p178_p10), %s644_s3, %s377_s6  ;;  %s259_s23 = sshll.u32 (!%p178_p10), %s211_s21, 4  ;;  %s260_s23 = int_to_ptr.vmem [resolvable:$true] %s259_s23 }
  0x12   : > { %s261_s26 = sshll.u32 (!%p178_p10), %s257_s10, 4  ;;  %s457_s5 = scalar_lea.hbm (!%p178_p10), %s644_s3, 16  ;;  %s262_s26 = int_to_ptr.hbm [resolvable:$true] %s261_s26 }
  0x13   : > { %s451_s27 = sshra.s32 (!%p178_p10), %s262_s26, 4  ;;  %s452_s27 = int_to_ptr.hbm [resolvable:$true] %s451_s27 }
  0x14   : > { %v228_v0 = vld [vmem:[%s641_s0] sm:$0xff]  ;;  %v517_v1 = vmov 0   ;;  %s223_s4 = scalar_select %p222_p11, %s507_s15, 1 }
  0x15   : > { %436 = vset.pattern.permute.xlu0 %v517_v1  ;;  %vm229_vm0 = vcmp.gt.f32.partialorder %v228_v0, 0.5  ;;  %v230_v3 = vld [vmem:[%s642_s1] sm:$0xff]  ;;  %s245_s15 = scalar_lea.sflag [#allocation3], %s209_s30  ;;  %s453_s28 = scalar_lea.hbm %s452_s27, 8 }
  0x16   : > { %v232_v2 = vsel %vm229_vm0, 1, %v517_v1  ;;  %s375_s7 = sshll.u32 %s223_s4, 3  ;;  %p454_p12 = scmp.ne.s32.totalorder %s452_s27, %s453_s28 }
  0x17   : > { %234 = vperm.xlu0 %436, %v232_v2   ;;  %s227_s19 = scalar_lea.vmem %s643_s2, %s375_s7  ;;  %p458_p1 = scmp.lt.s32.totalorder %s452_s27, %s644_s3 }
  0x18   : > { %v231_v5 = vld [vmem:[%s227_s19] sm:$0xff]  ;;  %p455_p13 = pnand %p454_p12, %p578_p4  ;;  %p459_p2 = scmp.lt.s32.totalorder %s457_s5, %s453_s28 }
  0x1a   : > { %p456_p0 = pneg %p455_p13  ;;  %p460_p3 = por %p459_p2, %p458_p1 }
  0x1c   : > { %p461_p5 = pnand %p460_p3, %p456_p0 }
  0x1f   : > { %239 = vperm.xlu0 %436, %v230_v3  }
  0x89   : > { %v235_v4 = vpop.permute.xlu0 %234 }
  0x8a   : > { %vm236_vm1 = vcmp.eq.s32.totalorder %v235_v4, 1 }
  0x91   : > { %v240_v6 = vpop.permute.xlu0 %239 }
  0x92   : > { %v242_v7 = vsel %vm236_vm1, %v240_v6, %v231_v5 }
  0x93   : > { %243 = vst [vmem:[%s211_s21] sm:$0xff] %v242_v7 }
  0x94   : > { %464 = shalt.err (!%p461_p5)
}
  0x95   : > { %380 = dma.vmem_to_hbm [thread:$0]  (%p578_p4), %s260_s23, 128, %s262_s26, %s245_s15  }
  0x96 PF: > { %p386_p6 = scmp.ge.s32.totalorder %s515_s17, 2  ;;  %s273_s30 = sand.u32 1, %s495_s12  }
  0x97   : > { %s274_s8 = scalar_lea.sflag [#allocation3], %s273_s30 }
  0x98   : > { %p383_p7 = pnand %p386_p6, %p585_p8 }
  0x9a   : > { %p384_p9 = pneg %p383_p7 }
  0x9c   : > { %490 = dma.done.wait (%p384_p9), %s274_s8, 128  }
  0x9d   : > { %492 = vsyncadd (%p384_p9), %s274_s8, 4294967168  ;;  %s16_s17 = sadd.s32 1, %s515_s17   ;;  %s647_s12 = smov %s499_s13 }
  0x9e   : > { %p13_p10 = scmp.ge.s32.totalorder %s16_s17, 4   ;;  %s648_s13 = smov %s503_s14 }
  0x9f   : > { %s649_s14 = smov %s591_s25  ;;  %s650_s15 = smov %s511_s16 }
  0xa0   : > { %s651_s16 = smov %s653_s20  ;;  %15 = sbr.rel (!%p13_p10) target bundleno = 4 (0x4), region = 73 }
  0xa5   :  { %280 = vsyncpa [#allocation3], 1 }
  0xa6   :  { %282 = vsyncpa [#allocation3 + $0x1], 1 }

</bundles_post_ra>
